<compile_context>
chip_gen: v6e
topology: v6e:2x2x1
jax: 0.10.0
libtpu: 0.0.40
codegen_flags: <defaults>
</compile_context>

<pallas_src>
import functools

import numpy as np
import jax
import jax.numpy as jnp
from jax import lax
from jax.experimental import pallas as pl
from jax.experimental.pallas import tpu as pltpu


def _round_up(x, m):
    return (x + m - 1) // m * m


def _cdiv(a, b):
    return -(-a // b)


@functools.lru_cache(maxsize=None)
def _vmem_budget():
    """(tile-search budget, vmem_limit_bytes, tm candidates) per generation."""
    try:
        cap = int(pltpu.get_tpu_info().vmem_capacity_bytes)
    except Exception:          # query unavailable -> be conservative (v7x-safe)
        cap = 64 * 1024 * 1024
    if cap >= 96 * 1024 * 1024:        # v5e / v6e: 128 MiB physical VMEM
        return 48 * 1024 * 1024, 64 * 1024 * 1024, (2048, 1024, 512, 384, 256, 128)
    # v7x (64 MiB per TensorCore) or unknown.
    return 24 * 1024 * 1024, 32 * 1024 * 1024, (512, 384, 256, 128)


# ---------------------------------------------------------------------------
# Path 1: fused in-kernel im2col + matmul (single pass over x).
# ---------------------------------------------------------------------------

def _make_fused_kernel(C, P, gw, R, K, compute_dtype):
    def kernel(x_ref, w_ref, b_ref, o_ref):
        # x_ref: (1, C, R, P, W)   original dtype, W = gw * P
        # w_ref: (K, E_pad)        compute dtype, rows ordered q = pw*(C*P)+c*P+ph
        # b_ref: (1, E_pad)        f32
        # o_ref: (1, R, gw, E_pad)
        rows = []
        for rr in range(R):
            # Per-channel (P, W) -> (W, P) 2-D XLU transposes, lane concat ->
            # (gw*P, C*P); row index g*P+pw, lane index c*P+ph.
            cols = [x_ref[0, c, rr].astype(compute_dtype).T for c in range(C)]
            t = cols[0] if C == 1 else jnp.concatenate(cols, axis=1)
            # im2col relayout: fold the per-patch pw rows into lanes,
            # (gw*P, C*P) -> (gw, K).  Hidden under the slab DMA.
            rows.append(t.reshape(gw, K))
        pb = rows[0] if R == 1 else jnp.concatenate(rows, axis=0)   # (R*gw, K)
        acc = jnp.dot(pb, w_ref[...], preferred_element_type=jnp.float32)
        res = (acc + b_ref[...]).astype(o_ref.dtype)
        for rr in range(R):
            o_ref[0, rr] = res[rr * gw:(rr + 1) * gw, :]
    return kernel


def _forward_fused(x, weight, bias, *, B, C, H, W, E, P, E_pad, R,
                   compute_dtype, out_dtype, vmem_limit):
    gh, gw = H // P, W // P
    K = C * P * P
    # Weight rows reordered to q = pw*(C*P) + c*P + ph to match the in-kernel
    # patch layout (free, tiny, done once per call by XLA).
    wperm = weight.transpose(3, 1, 2, 0).reshape(K, E).astype(compute_dtype)
    b2d = bias.reshape(1, E).astype(jnp.float32)
    if E_pad != E:
        wperm = jnp.pad(wperm, ((0, 0), (0, E_pad - E)))
        b2d = jnp.pad(b2d, ((0, 0), (0, E_pad - E)))
    x5 = x.reshape(B, C, gh, P, W)          # free contiguous view of NCHW
    # TODO(synk): sweep pipeline_mode=pl.Buffered(3) on the slab input if xprof
    # shows exposed DMA (skip when VMEM headroom is tight on v7x).
    out = pl.pallas_call(
        _make_fused_kernel(C, P, gw, R, K, compute_dtype),
        out_shape=jax.ShapeDtypeStruct((B, gh, gw, E_pad), out_dtype),
        grid_spec=pltpu.PrefetchScalarGridSpec(
            num_scalar_prefetch=0,
            grid=(B, gh // R),
            in_specs=[
                # Rectangular slab of R patch rows; the last two block dims
                # equal the full array dims, so any C / P / W is legal.
                pl.BlockSpec((1, C, R, P, W), lambda b, r: (b, 0, r, 0, 0)),
                pl.BlockSpec((K, E_pad), lambda b, r: (0, 0)),     # resident
                pl.BlockSpec((1, E_pad), lambda b, r: (0, 0)),     # resident
            ],
            out_specs=pl.BlockSpec((1, R, gw, E_pad), lambda b, r: (b, r, 0, 0)),
        ),
        compiler_params=pltpu.CompilerParams(
            dimension_semantics=("parallel", "parallel"),
            vmem_limit_bytes=vmem_limit,
        ),
    )(x5, wperm, b2d)
    return out.reshape(B, gh * gw, E_pad)[:, :, :E]


# ---------------------------------------------------------------------------
# Path 2: wrapper-side im2col + streamed matmul (known-good fallback).
# ---------------------------------------------------------------------------

def _matmul_kernel(p_ref, w_ref, b_ref, o_ref):
    # p_ref: (tm, K_pad)  w_ref: (K_pad, E_pad)  b_ref: (1, E_pad)  o_ref: (tm, E_pad)
    acc = jnp.dot(p_ref[...], w_ref[...], preferred_element_type=jnp.float32)
    o_ref[...] = (acc + b_ref[...]).astype(o_ref.dtype)


def _forward_im2col(x, weight, bias, *, B, C, H, W, E, P, E_pad, K_pad,
                    tm, grid_m, M_pad, compute_dtype, out_dtype, vmem_limit):
    gh, gw = H // P, W // P
    M = B * gh * gw
    K = C * P * P
    # im2col (fused by XLA inside this jit; casting before the transpose halves
    # the intermediate's HBM traffic when compute_dtype is bf16).
    xc = x.astype(compute_dtype)
    patches = (xc.reshape(B, C, gh, P, gw, P)
                 .transpose(0, 2, 4, 1, 3, 5)            # (B, gh, gw, C, P, P)
                 .reshape(M, K))
    if M_pad != M or K_pad != K:
        patches = jnp.pad(patches, ((0, M_pad - M), (0, K_pad - K)))
    w2d = weight.reshape(E, K).T.astype(compute_dtype)    # (K, E), (c, ph, pw) rows
    b2d = bias.reshape(1, E).astype(jnp.float32)
    if K_pad != K or E_pad != E:
        w2d = jnp.pad(w2d, ((0, K_pad - K), (0, E_pad - E)))
    if E_pad != E:
        b2d = jnp.pad(b2d, ((0, 0), (0, E_pad - E)))
    out = pl.pallas_call(
        _matmul_kernel,
        out_shape=jax.ShapeDtypeStruct((M_pad, E_pad), out_dtype),
        grid_spec=pltpu.PrefetchScalarGridSpec(
            num_scalar_prefetch=0,
            grid=(grid_m,),
            in_specs=[
                pl.BlockSpec((tm, K_pad), lambda i: (i, 0)),       # streamed
                pl.BlockSpec((K_pad, E_pad), lambda i: (0, 0)),    # resident
                pl.BlockSpec((1, E_pad), lambda i: (0, 0)),        # resident
            ],
            out_specs=pl.BlockSpec((tm, E_pad), lambda i: (i, 0)),
        ),
        compiler_params=pltpu.CompilerParams(
            dimension_semantics=("parallel",),
            vmem_limit_bytes=vmem_limit,
        ),
    )(patches, w2d, b2d)
    return out[:M, :E].reshape(B, gh * gw, E)


# ---------------------------------------------------------------------------
# Per-config planning, compile check of the fused path, and dispatch.
# ---------------------------------------------------------------------------

@functools.lru_cache(maxsize=None)
def _get_impl(B, C, H, W, E, P, x_dtype, compute_dtype, out_dtype):
    gh, gw = H // P, W // P
    M = B * gh * gw
    K = C * P * P
    E_pad = _round_up(E, 128)        # lane-dense (unmasked) output stores
    K_pad = _round_up(K, 128)        # lane-dense patch loads, full MXU K passes
    c_bytes = np.dtype(compute_dtype).itemsize
    x_bytes = np.dtype(x_dtype).itemsize
    o_bytes = np.dtype(out_dtype).itemsize
    budget, vmem_limit, tm_candidates = _vmem_budget()
    headroom = 2 * 1024 * 1024       # Mosaic internal scratch etc.
    # TODO(synk): add an E grid axis (tile 512-1024, "parallel") for very large
    # embed dims (E_pad >= ~2048) so the resident weight / acc blocks shrink.

    # ---- fallback (im2col) path tiling ------------------------------------
    resident = K_pad * E_pad * c_bytes + E_pad * 4
    def _fits(t):
        # double-buffered input + output blocks, plus the f32 matmul result.
        stream = 2 * t * K_pad * c_bytes + 2 * t * E_pad * o_bytes + t * E_pad * 4
        return resident + stream + headroom <= budget
    tm_max = next((t for t in tm_candidates if _fits(t)), 128)
    row_granule = 16 if c_bytes < 4 else 8     # bf16 packs 2 rows per sublane
    if M <= 128:
        tm, grid_m = _round_up(max(M, row_granule), row_granule), 1
    else:
        # Balanced tiles so both v7x TensorCores get ~equal useful work.
        grid_m = max(2, _cdiv(M, tm_max))
        if grid_m % 2:
            grid_m += 1
        tm = min(tm_max, _round_up(_cdiv(M, grid_m), 128))
        grid_m = _cdiv(M, tm)
    M_pad = tm * grid_m

    common = dict(B=B, C=C, H=H, W=W, E=E, P=P, E_pad=E_pad,
                  compute_dtype=compute_dtype, out_dtype=out_dtype,
                  vmem_limit=vmem_limit)
    im2col_fn = jax.jit(functools.partial(
        _forward_im2col, K_pad=K_pad, tm=tm, grid_m=grid_m, M_pad=M_pad, **common))

    # ---- fused path: R = patch rows handled per grid step -----------------
    fused_res = K * E_pad * c_bytes + E_pad * 4
    def _fused_fits(r):
        xblk = 2 * C * r * P * W * x_bytes               # double-buffered slab
        oblk = 2 * r * gw * E_pad * o_bytes              # double-buffered out
        tmp = r * gw * (K * c_bytes + E_pad * 4) + C * r * P * W * c_bytes
        return fused_res + xblk + oblk + tmp + headroom <= budget
    divisors = [d for d in range(gh, 0, -1) if gh % d == 0]
    R = next((d for d in divisors if _fused_fits(d)), 1)
    if B * (gh // R) < 2:                                # keep >= 2 grid steps
        for d in divisors:
            if gh // d >= 2 and _fused_fits(d):
                R = d
                break
    fused_fn = jax.jit(functools.partial(_forward_fused, R=R, **common))

    # ---- compile + numerically validate the fused path, else fall back ----
    try:
        kx, kw2, kb = jax.random.split(jax.random.PRNGKey(123), 3)
        px = jax.random.normal(kx, (B, C, H, W), jnp.float32).astype(x_dtype)
        pw = jax.random.normal(kw2, (E, C, P, P), jnp.float32) * (K ** -0.5)
        pb = jax.random.normal(kb, (E,), jnp.float32) * 0.1
        got = jax.block_until_ready(fused_fn(px, pw, pb)).astype(jnp.float32)
        want = jax.block_until_ready(im2col_fn(px, pw, pb)).astype(jnp.float32)
        exact = c_bytes >= 4 and o_bytes >= 4
        tol = 1e-5 if exact else 1e-2
        if bool(jnp.allclose(got, want, atol=tol, rtol=tol)):
            return fused_fn
    except Exception:
        pass
    return im2col_fn


def patch_embedding(x, weight, bias, patch_size, compute_dtype=jnp.bfloat16,
                    out_dtype=None):
    """Conv2d(kernel=stride=patch_size) + flatten(2).transpose(1, 2).

    compute_dtype: MXU operand dtype (bf16 default = fast path; f32 = exact,
                   matching PyTorch's f32 Conv2d).
    out_dtype:     output dtype; defaults to x.dtype.  Set to bf16 to halve the
                   output HBM traffic if the downstream consumer tolerates it.
    """
    B, C, H, W = x.shape
    E = weight.shape[0]
    P = int(patch_size)
    assert H % P == 0 and W % P == 0, "image dims must be divisible by patch size"
    odt = np.dtype(out_dtype) if out_dtype is not None else np.dtype(x.dtype)
    fn = _get_impl(B, C, H, W, E, P,
                   np.dtype(x.dtype), np.dtype(compute_dtype), odt)
    return fn(x, weight, bias)


def _reference(x, weight, bias, patch_size):
    # Reference via XLA conv, NCHW / OIHW, stride = kernel = patch_size.
    y = lax.conv_general_dilated(
        x, weight,
        window_strides=(patch_size, patch_size),
        padding="VALID",
        dimension_numbers=("NCHW", "OIHW", "NCHW"),
    ) + bias.reshape(1, -1, 1, 1)
    B, E, gh, gw = y.shape
    return y.reshape(B, E, gh * gw).transpose(0, 2, 1)


if __name__ == "__main__":
    # Small shapes consistent with the module's forward.
    B, C, image_size, patch_size, embed_dim = 2, 4, 16, 4, 32
    num_patches = (image_size // patch_size) ** 2  # 16

    key = jax.random.PRNGKey(0)
    kx, kw, kb = jax.random.split(key, 3)

    x = jax.random.normal(kx, (B, C, image_size, image_size), dtype=jnp.float32)
    # Deterministic synthetic Conv2d parameters (shapes as in nn.Conv2d init).
    fan_in = C * patch_size * patch_size
    bound = 1.0 / (fan_in ** 0.5)
    weight = jax.random.uniform(
        kw, (embed_dim, C, patch_size, patch_size),
        minval=-bound, maxval=bound, dtype=jnp.float32)
    bias = jax.random.uniform(
        kb, (embed_dim,), minval=-bound, maxval=bound, dtype=jnp.float32)

    ref = _reference(x, weight, bias, patch_size)

    # Fast path: bf16 MXU operands with f32 accumulation.
    out_bf16 = jax.block_until_ready(
        patch_embedding(x, weight, bias, patch_size))
    assert out_bf16.shape == (B, num_patches, embed_dim), out_bf16.shape
    assert jnp.allclose(out_bf16, ref, atol=5e-2, rtol=5e-2), \
        "bf16 path mismatch vs reference"

    # Exact path: f32 operands, tight-tolerance verification.
    out_f32 = jax.block_until_ready(
        patch_embedding(x, weight, bias, patch_size, compute_dtype=jnp.float32))
    assert out_f32.shape == (B, num_patches, embed_dim), out_f32.shape
    assert jnp.allclose(out_f32, ref, atol=1e-4, rtol=1e-4), \
        "f32 path mismatch vs reference"

    print("KERNEL_OK")
</pallas_src>

<mosaic_0001>
module attributes {stable_mosaic.version = 11 : i64} {
  func.func @kernel(%arg0: i32, %arg1: i32, %arg2: memref<1x4x4x4x16xf32, #tpu.memory_space<vmem>>, %arg3: memref<64x128xbf16, #tpu.memory_space<vmem>>, %arg4: memref<1x128xf32, #tpu.memory_space<vmem>>, %arg5: memref<1x4x4x128xf32, #tpu.memory_space<vmem>>) attributes {dimension_semantics = [#tpu.dimension_semantics<parallel>, #tpu.dimension_semantics<parallel>], iteration_bounds = array<i64: 2, 1>, scalar_prefetch = 0 : i64, scratch_operands = 0 : i64, tpu.core_type = #tpu.core_type<tc>, window_params = [{transform_indices = @transform_0, window_bounds = array<i64: 1, 4, 4, 4, 16>}, {pipeline_mode = #tpu.pipeline_mode<synchronous>, transform_indices = @transform_1, window_bounds = array<i64: 64, 128>}, {pipeline_mode = #tpu.pipeline_mode<synchronous>, transform_indices = @transform_2, window_bounds = array<i64: 1, 128>}, {transform_indices = @transform_3, window_bounds = array<i64: 1, 4, 4, 128>}]} {
    %c0 = arith.constant 0 : index
    %c0_0 = arith.constant 0 : index
    %c0_1 = arith.constant 0 : index
    %c0_2 = arith.constant 0 : index
    %c0_3 = arith.constant 0 : index
    %0 = vector.load %arg2[%c0, %c0_0, %c0_1, %c0_2, %c0_3] : memref<1x4x4x4x16xf32, #tpu.memory_space<vmem>>, vector<1x1x1x4x16xf32>
    %1 = vector.shape_cast %0 : vector<1x1x1x4x16xf32> to vector<4x16xf32>
    %2 = arith.truncf %1 : vector<4x16xf32> to vector<4x16xbf16>
    %3 = tpu.transpose %2, [1, 0] : vector<4x16xbf16> -> vector<16x4xbf16>
    %c0_4 = arith.constant 0 : index
    %c1 = arith.constant 1 : index
    %c0_5 = arith.constant 0 : index
    %c0_6 = arith.constant 0 : index
    %c0_7 = arith.constant 0 : index
    %4 = vector.load %arg2[%c0_4, %c1, %c0_5, %c0_6, %c0_7] : memref<1x4x4x4x16xf32, #tpu.memory_space<vmem>>, vector<1x1x1x4x16xf32>
    %5 = vector.shape_cast %4 : vector<1x1x1x4x16xf32> to vector<4x16xf32>
    %6 = arith.truncf %5 : vector<4x16xf32> to vector<4x16xbf16>
    %7 = tpu.transpose %6, [1, 0] : vector<4x16xbf16> -> vector<16x4xbf16>
    %c0_8 = arith.constant 0 : index
    %c2 = arith.constant 2 : index
    %c0_9 = arith.constant 0 : index
    %c0_10 = arith.constant 0 : index
    %c0_11 = arith.constant 0 : index
    %8 = vector.load %arg2[%c0_8, %c2, %c0_9, %c0_10, %c0_11] : memref<1x4x4x4x16xf32, #tpu.memory_space<vmem>>, vector<1x1x1x4x16xf32>
    %9 = vector.shape_cast %8 : vector<1x1x1x4x16xf32> to vector<4x16xf32>
    %10 = arith.truncf %9 : vector<4x16xf32> to vector<4x16xbf16>
    %11 = tpu.transpose %10, [1, 0] : vector<4x16xbf16> -> vector<16x4xbf16>
    %c0_12 = arith.constant 0 : index
    %c3 = arith.constant 3 : index
    %c0_13 = arith.constant 0 : index
    %c0_14 = arith.constant 0 : index
    %c0_15 = arith.constant 0 : index
    %12 = vector.load %arg2[%c0_12, %c3, %c0_13, %c0_14, %c0_15] : memref<1x4x4x4x16xf32, #tpu.memory_space<vmem>>, vector<1x1x1x4x16xf32>
    %13 = vector.shape_cast %12 : vector<1x1x1x4x16xf32> to vector<4x16xf32>
    %14 = arith.truncf %13 : vector<4x16xf32> to vector<4x16xbf16>
    %15 = tpu.transpose %14, [1, 0] : vector<4x16xbf16> -> vector<16x4xbf16>
    %16 = tpu.concatenate %3, %7, %11, %15 in 1 : vector<16x4xbf16>, vector<16x4xbf16>, vector<16x4xbf16>, vector<16x4xbf16> -> vector<16x16xbf16>
    %17 = vector.shape_cast %16 : vector<16x16xbf16> to vector<4x64xbf16>
    %c0_16 = arith.constant 0 : index
    %c0_17 = arith.constant 0 : index
    %c1_18 = arith.constant 1 : index
    %c0_19 = arith.constant 0 : index
    %c0_20 = arith.constant 0 : index
    %18 = vector.load %arg2[%c0_16, %c0_17, %c1_18, %c0_19, %c0_20] : memref<1x4x4x4x16xf32, #tpu.memory_space<vmem>>, vector<1x1x1x4x16xf32>
    %19 = vector.shape_cast %18 : vector<1x1x1x4x16xf32> to vector<4x16xf32>
    %20 = arith.truncf %19 : vector<4x16xf32> to vector<4x16xbf16>
    %21 = tpu.transpose %20, [1, 0] : vector<4x16xbf16> -> vector<16x4xbf16>
    %c0_21 = arith.constant 0 : index
    %c1_22 = arith.constant 1 : index
    %c1_23 = arith.constant 1 : index
    %c0_24 = arith.constant 0 : index
    %c0_25 = arith.constant 0 : index
    %22 = vector.load %arg2[%c0_21, %c1_22, %c1_23, %c0_24, %c0_25] : memref<1x4x4x4x16xf32, #tpu.memory_space<vmem>>, vector<1x1x1x4x16xf32>
    %23 = vector.shape_cast %22 : vector<1x1x1x4x16xf32> to vector<4x16xf32>
    %24 = arith.truncf %23 : vector<4x16xf32> to vector<4x16xbf16>
    %25 = tpu.transpose %24, [1, 0] : vector<4x16xbf16> -> vector<16x4xbf16>
    %c0_26 = arith.constant 0 : index
    %c2_27 = arith.constant 2 : index
    %c1_28 = arith.constant 1 : index
    %c0_29 = arith.constant 0 : index
    %c0_30 = arith.constant 0 : index
    %26 = vector.load %arg2[%c0_26, %c2_27, %c1_28, %c0_29, %c0_30] : memref<1x4x4x4x16xf32, #tpu.memory_space<vmem>>, vector<1x1x1x4x16xf32>
    %27 = vector.shape_cast %26 : vector<1x1x1x4x16xf32> to vector<4x16xf32>
    %28 = arith.truncf %27 : vector<4x16xf32> to vector<4x16xbf16>
    %29 = tpu.transpose %28, [1, 0] : vector<4x16xbf16> -> vector<16x4xbf16>
    %c0_31 = arith.constant 0 : index
    %c3_32 = arith.constant 3 : index
    %c1_33 = arith.constant 1 : index
    %c0_34 = arith.constant 0 : index
    %c0_35 = arith.constant 0 : index
    %30 = vector.load %arg2[%c0_31, %c3_32, %c1_33, %c0_34, %c0_35] : memref<1x4x4x4x16xf32, #tpu.memory_space<vmem>>, vector<1x1x1x4x16xf32>
    %31 = vector.shape_cast %30 : vector<1x1x1x4x16xf32> to vector<4x16xf32>
    %32 = arith.truncf %31 : vector<4x16xf32> to vector<4x16xbf16>
    %33 = tpu.transpose %32, [1, 0] : vector<4x16xbf16> -> vector<16x4xbf16>
    %34 = tpu.concatenate %21, %25, %29, %33 in 1 : vector<16x4xbf16>, vector<16x4xbf16>, vector<16x4xbf16>, vector<16x4xbf16> -> vector<16x16xbf16>
    %35 = vector.shape_cast %34 : vector<16x16xbf16> to vector<4x64xbf16>
    %c0_36 = arith.constant 0 : index
    %c0_37 = arith.constant 0 : index
    %c2_38 = arith.constant 2 : index
    %c0_39 = arith.constant 0 : index
    %c0_40 = arith.constant 0 : index
    %36 = vector.load %arg2[%c0_36, %c0_37, %c2_38, %c0_39, %c0_40] : memref<1x4x4x4x16xf32, #tpu.memory_space<vmem>>, vector<1x1x1x4x16xf32>
    %37 = vector.shape_cast %36 : vector<1x1x1x4x16xf32> to vector<4x16xf32>
    %38 = arith.truncf %37 : vector<4x16xf32> to vector<4x16xbf16>
    %39 = tpu.transpose %38, [1, 0] : vector<4x16xbf16> -> vector<16x4xbf16>
    %c0_41 = arith.constant 0 : index
    %c1_42 = arith.constant 1 : index
    %c2_43 = arith.constant 2 : index
    %c0_44 = arith.constant 0 : index
    %c0_45 = arith.constant 0 : index
    %40 = vector.load %arg2[%c0_41, %c1_42, %c2_43, %c0_44, %c0_45] : memref<1x4x4x4x16xf32, #tpu.memory_space<vmem>>, vector<1x1x1x4x16xf32>
    %41 = vector.shape_cast %40 : vector<1x1x1x4x16xf32> to vector<4x16xf32>
    %42 = arith.truncf %41 : vector<4x16xf32> to vector<4x16xbf16>
    %43 = tpu.transpose %42, [1, 0] : vector<4x16xbf16> -> vector<16x4xbf16>
    %c0_46 = arith.constant 0 : index
    %c2_47 = arith.constant 2 : index
    %c2_48 = arith.constant 2 : index
    %c0_49 = arith.constant 0 : index
    %c0_50 = arith.constant 0 : index
    %44 = vector.load %arg2[%c0_46, %c2_47, %c2_48, %c0_49, %c0_50] : memref<1x4x4x4x16xf32, #tpu.memory_space<vmem>>, vector<1x1x1x4x16xf32>
    %45 = vector.shape_cast %44 : vector<1x1x1x4x16xf32> to vector<4x16xf32>
    %46 = arith.truncf %45 : vector<4x16xf32> to vector<4x16xbf16>
    %47 = tpu.transpose %46, [1, 0] : vector<4x16xbf16> -> vector<16x4xbf16>
    %c0_51 = arith.constant 0 : index
    %c3_52 = arith.constant 3 : index
    %c2_53 = arith.constant 2 : index
    %c0_54 = arith.constant 0 : index
    %c0_55 = arith.constant 0 : index
    %48 = vector.load %arg2[%c0_51, %c3_52, %c2_53, %c0_54, %c0_55] : memref<1x4x4x4x16xf32, #tpu.memory_space<vmem>>, vector<1x1x1x4x16xf32>
    %49 = vector.shape_cast %48 : vector<1x1x1x4x16xf32> to vector<4x16xf32>
    %50 = arith.truncf %49 : vector<4x16xf32> to vector<4x16xbf16>
    %51 = tpu.transpose %50, [1, 0] : vector<4x16xbf16> -> vector<16x4xbf16>
    %52 = tpu.concatenate %39, %43, %47, %51 in 1 : vector<16x4xbf16>, vector<16x4xbf16>, vector<16x4xbf16>, vector<16x4xbf16> -> vector<16x16xbf16>
    %53 = vector.shape_cast %52 : vector<16x16xbf16> to vector<4x64xbf16>
    %c0_56 = arith.constant 0 : index
    %c0_57 = arith.constant 0 : index
    %c3_58 = arith.constant 3 : index
    %c0_59 = arith.constant 0 : index
    %c0_60 = arith.constant 0 : index
    %54 = vector.load %arg2[%c0_56, %c0_57, %c3_58, %c0_59, %c0_60] : memref<1x4x4x4x16xf32, #tpu.memory_space<vmem>>, vector<1x1x1x4x16xf32>
    %55 = vector.shape_cast %54 : vector<1x1x1x4x16xf32> to vector<4x16xf32>
    %56 = arith.truncf %55 : vector<4x16xf32> to vector<4x16xbf16>
    %57 = tpu.transpose %56, [1, 0] : vector<4x16xbf16> -> vector<16x4xbf16>
    %c0_61 = arith.constant 0 : index
    %c1_62 = arith.constant 1 : index
    %c3_63 = arith.constant 3 : index
    %c0_64 = arith.constant 0 : index
    %c0_65 = arith.constant 0 : index
    %58 = vector.load %arg2[%c0_61, %c1_62, %c3_63, %c0_64, %c0_65] : memref<1x4x4x4x16xf32, #tpu.memory_space<vmem>>, vector<1x1x1x4x16xf32>
    %59 = vector.shape_cast %58 : vector<1x1x1x4x16xf32> to vector<4x16xf32>
    %60 = arith.truncf %59 : vector<4x16xf32> to vector<4x16xbf16>
    %61 = tpu.transpose %60, [1, 0] : vector<4x16xbf16> -> vector<16x4xbf16>
    %c0_66 = arith.constant 0 : index
    %c2_67 = arith.constant 2 : index
    %c3_68 = arith.constant 3 : index
    %c0_69 = arith.constant 0 : index
    %c0_70 = arith.constant 0 : index
    %62 = vector.load %arg2[%c0_66, %c2_67, %c3_68, %c0_69, %c0_70] : memref<1x4x4x4x16xf32, #tpu.memory_space<vmem>>, vector<1x1x1x4x16xf32>
    %63 = vector.shape_cast %62 : vector<1x1x1x4x16xf32> to vector<4x16xf32>
    %64 = arith.truncf %63 : vector<4x16xf32> to vector<4x16xbf16>
    %65 = tpu.transpose %64, [1, 0] : vector<4x16xbf16> -> vector<16x4xbf16>
    %c0_71 = arith.constant 0 : index
    %c3_72 = arith.constant 3 : index
    %c3_73 = arith.constant 3 : index
    %c0_74 = arith.constant 0 : index
    %c0_75 = arith.constant 0 : index
    %66 = vector.load %arg2[%c0_71, %c3_72, %c3_73, %c0_74, %c0_75] : memref<1x4x4x4x16xf32, #tpu.memory_space<vmem>>, vector<1x1x1x4x16xf32>
    %67 = vector.shape_cast %66 : vector<1x1x1x4x16xf32> to vector<4x16xf32>
    %68 = arith.truncf %67 : vector<4x16xf32> to vector<4x16xbf16>
    %69 = tpu.transpose %68, [1, 0] : vector<4x16xbf16> -> vector<16x4xbf16>
    %70 = tpu.concatenate %57, %61, %65, %69 in 1 : vector<16x4xbf16>, vector<16x4xbf16>, vector<16x4xbf16>, vector<16x4xbf16> -> vector<16x16xbf16>
    %71 = vector.shape_cast %70 : vector<16x16xbf16> to vector<4x64xbf16>
    %72 = tpu.concatenate %17, %35, %53, %71 in 0 : vector<4x64xbf16>, vector<4x64xbf16>, vector<4x64xbf16>, vector<4x64xbf16> -> vector<16x64xbf16>
    %c0_76 = arith.constant 0 : index
    %c0_77 = arith.constant 0 : index
    %73 = vector.load %arg3[%c0_76, %c0_77] : memref<64x128xbf16, #tpu.memory_space<vmem>>, vector<64x128xbf16>
    %cst = arith.constant dense<0.000000e+00> : vector<16x128xf32>
    %74 = tpu.matmul %72, %73, %cst {dimension_numbers = #tpu.dot_dimension_numbers<[1], [0], [0], [1], [0, 0, 1, 1], [], []>} : vector<16x64xbf16>, vector<64x128xbf16>, vector<16x128xf32> -> vector<16x128xf32>
    %c0_78 = arith.constant 0 : index
    %c0_79 = arith.constant 0 : index
    %75 = vector.load %arg4[%c0_78, %c0_79] : memref<1x128xf32, #tpu.memory_space<vmem>>, vector<1x128xf32>
    %76 = vector.broadcast %75 : vector<1x128xf32> to vector<16x128xf32>
    %77 = arith.addf %74, %76 : vector<16x128xf32>
    %78 = vector.extract_strided_slice %77 {offsets = [0, 0], sizes = [4, 128], strides = [1, 1]} : vector<16x128xf32> to vector<4x128xf32>
    %c0_80 = arith.constant 0 : index
    %c0_81 = arith.constant 0 : index
    %c0_82 = arith.constant 0 : index
    %c0_83 = arith.constant 0 : index
    %79 = vector.load %arg5[%c0_80, %c0_81, %c0_82, %c0_83] : memref<1x4x4x128xf32, #tpu.memory_space<vmem>>, vector<1x1x4x128xf32>
    %80 = vector.shape_cast %79 : vector<1x1x4x128xf32> to vector<4x128xf32>
    %81 = vector.shape_cast %78 : vector<4x128xf32> to vector<1x1x4x128xf32>
    tpu.vector_store %arg5[%c0_80, %c0_81, %c0_82, %c0_83], %81 {strides = array<i32>} : memref<1x4x4x128xf32, #tpu.memory_space<vmem>>, vector<1x1x4x128xf32>,
    %82 = vector.extract_strided_slice %77 {offsets = [4, 0], sizes = [4, 128], strides = [1, 1]} : vector<16x128xf32> to vector<4x128xf32>
    %c0_84 = arith.constant 0 : index
    %c1_85 = arith.constant 1 : index
    %c0_86 = arith.constant 0 : index
    %c0_87 = arith.constant 0 : index
    %83 = vector.load %arg5[%c0_84, %c1_85, %c0_86, %c0_87] : memref<1x4x4x128xf32, #tpu.memory_space<vmem>>, vector<1x1x4x128xf32>
    %84 = vector.shape_cast %83 : vector<1x1x4x128xf32> to vector<4x128xf32>
    %85 = vector.shape_cast %82 : vector<4x128xf32> to vector<1x1x4x128xf32>
    tpu.vector_store %arg5[%c0_84, %c1_85, %c0_86, %c0_87], %85 {strides = array<i32>} : memref<1x4x4x128xf32, #tpu.memory_space<vmem>>, vector<1x1x4x128xf32>,
    %86 = vector.extract_strided_slice %77 {offsets = [8, 0], sizes = [4, 128], strides = [1, 1]} : vector<16x128xf32> to vector<4x128xf32>
    %c0_88 = arith.constant 0 : index
    %c2_89 = arith.constant 2 : index
    %c0_90 = arith.constant 0 : index
    %c0_91 = arith.constant 0 : index
    %87 = vector.load %arg5[%c0_88, %c2_89, %c0_90, %c0_91] : memref<1x4x4x128xf32, #tpu.memory_space<vmem>>, vector<1x1x4x128xf32>
    %88 = vector.shape_cast %87 : vector<1x1x4x128xf32> to vector<4x128xf32>
    %89 = vector.shape_cast %86 : vector<4x128xf32> to vector<1x1x4x128xf32>
    tpu.vector_store %arg5[%c0_88, %c2_89, %c0_90, %c0_91], %89 {strides = array<i32>} : memref<1x4x4x128xf32, #tpu.memory_space<vmem>>, vector<1x1x4x128xf32>,
    %90 = vector.extract_strided_slice %77 {offsets = [12, 0], sizes = [4, 128], strides = [1, 1]} : vector<16x128xf32> to vector<4x128xf32>
    %c0_92 = arith.constant 0 : index
    %c3_93 = arith.constant 3 : index
    %c0_94 = arith.constant 0 : index
    %c0_95 = arith.constant 0 : index
    %91 = vector.load %arg5[%c0_92, %c3_93, %c0_94, %c0_95] : memref<1x4x4x128xf32, #tpu.memory_space<vmem>>, vector<1x1x4x128xf32>
    %92 = vector.shape_cast %91 : vector<1x1x4x128xf32> to vector<4x128xf32>
    %93 = vector.shape_cast %90 : vector<4x128xf32> to vector<1x1x4x128xf32>
    tpu.vector_store %arg5[%c0_92, %c3_93, %c0_94, %c0_95], %93 {strides = array<i32>} : memref<1x4x4x128xf32, #tpu.memory_space<vmem>>, vector<1x1x4x128xf32>,
    return
  }
  func.func @transform_0(%arg0: i32, %arg1: i32) -> (i32, i32, i32, i32, i32) {
    %c0_i32 = arith.constant 0 : i32
    %c0_i32_0 = arith.constant 0 : i32
    %c0_i32_1 = arith.constant 0 : i32
    %c0_i32_2 = arith.constant 0 : i32
    return %arg0, %c0_i32, %arg1, %c0_i32_0, %c0_i32_1 : i32, i32, i32, i32, i32
  }
  func.func @transform_1(%arg0: i32, %arg1: i32) -> (i32, i32) {
    %c0_i32 = arith.constant 0 : i32
    %c0_i32_0 = arith.constant 0 : i32
    %c0_i32_1 = arith.constant 0 : i32
    return %c0_i32, %c0_i32_0 : i32, i32
  }
  func.func @transform_2(%arg0: i32, %arg1: i32) -> (i32, i32) {
    %c0_i32 = arith.constant 0 : i32
    %c0_i32_0 = arith.constant 0 : i32
    %c0_i32_1 = arith.constant 0 : i32
    return %c0_i32, %c0_i32_0 : i32, i32
  }
  func.func @transform_3(%arg0: i32, %arg1: i32) -> (i32, i32, i32, i32) {
    %c0_i32 = arith.constant 0 : i32
    %c0_i32_0 = arith.constant 0 : i32
    %c0_i32_1 = arith.constant 0 : i32
    return %arg0, %arg1, %c0_i32, %c0_i32_0 : i32, i32, i32, i32
  }
}

module attributes {stable_mosaic.version = 11 : i64} {
  func.func @_matmul_kernel(%arg0: i32, %arg1: memref<32x128xbf16, #tpu.memory_space<vmem>>, %arg2: memref<128x128xbf16, #tpu.memory_space<vmem>>, %arg3: memref<1x128xf32, #tpu.memory_space<vmem>>, %arg4: memref<32x128xf32, #tpu.memory_space<vmem>>) attributes {dimension_semantics = [#tpu.dimension_semantics<parallel>], iteration_bounds = array<i64: 1>, scalar_prefetch = 0 : i64, scratch_operands = 0 : i64, tpu.core_type = #tpu.core_type<tc>, window_params = [{transform_indices = @transform_0, window_bounds = array<i64: 32, 128>}, {pipeline_mode = #tpu.pipeline_mode<synchronous>, transform_indices = @transform_1, window_bounds = array<i64: 128, 128>}, {pipeline_mode = #tpu.pipeline_mode<synchronous>, transform_indices = @transform_2, window_bounds = array<i64: 1, 128>}, {transform_indices = @transform_3, window_bounds = array<i64: 32, 128>}]} {
    %c0 = arith.constant 0 : index
    %c0_0 = arith.constant 0 : index
    %0 = vector.load %arg1[%c0, %c0_0] : memref<32x128xbf16, #tpu.memory_space<vmem>>, vector<32x128xbf16>
    %c0_1 = arith.constant 0 : index
    %c0_2 = arith.constant 0 : index
    %1 = vector.load %arg2[%c0_1, %c0_2] : memref<128x128xbf16, #tpu.memory_space<vmem>>, vector<128x128xbf16>
    %cst = arith.constant dense<0.000000e+00> : vector<32x128xf32>
    %2 = tpu.matmul %0, %1, %cst {dimension_numbers = #tpu.dot_dimension_numbers<[1], [0], [0], [1], [0, 0, 1, 1], [], []>} : vector<32x128xbf16>, vector<128x128xbf16>, vector<32x128xf32> -> vector<32x128xf32>
    %c0_3 = arith.constant 0 : index
    %c0_4 = arith.constant 0 : index
    %3 = vector.load %arg3[%c0_3, %c0_4] : memref<1x128xf32, #tpu.memory_space<vmem>>, vector<1x128xf32>
    %4 = vector.broadcast %3 : vector<1x128xf32> to vector<32x128xf32>
    %5 = arith.addf %2, %4 : vector<32x128xf32>
    %c0_5 = arith.constant 0 : index
    %c0_6 = arith.constant 0 : index
    %6 = vector.load %arg4[%c0_5, %c0_6] : memref<32x128xf32, #tpu.memory_space<vmem>>, vector<32x128xf32>
    tpu.vector_store %arg4[%c0_5, %c0_6], %5 {strides = array<i32>} : memref<32x128xf32, #tpu.memory_space<vmem>>, vector<32x128xf32>,
    return
  }
  func.func @transform_0(%arg0: i32) -> (i32, i32) {
    %c0_i32 = arith.constant 0 : i32
    %c0_i32_0 = arith.constant 0 : i32
    return %arg0, %c0_i32 : i32, i32
  }
  func.func @transform_1(%arg0: i32) -> (i32, i32) {
    %c0_i32 = arith.constant 0 : i32
    %c0_i32_0 = arith.constant 0 : i32
    %c0_i32_1 = arith.constant 0 : i32
    return %c0_i32, %c0_i32_0 : i32, i32
  }
  func.func @transform_2(%arg0: i32) -> (i32, i32) {
    %c0_i32 = arith.constant 0 : i32
    %c0_i32_0 = arith.constant 0 : i32
    %c0_i32_1 = arith.constant 0 : i32
    return %c0_i32, %c0_i32_0 : i32, i32
  }
  func.func @transform_3(%arg0: i32) -> (i32, i32) {
    %c0_i32 = arith.constant 0 : i32
    %c0_i32_0 = arith.constant 0 : i32
    return %arg0, %c0_i32 : i32, i32
  }
}

</mosaic_0001>

<bundles_post_ra>
// kernel: _forward_im2col.1
= control target key start
LH: loop header
LB: loop body
LE: loop exit
PB: predicated region body
PF: predicated region fallthrough
CT: control target
= control target key end

     0   :  { %s307_s0 = inlined_call_operand.vmem [shape: bf16[32,128], index: 0, kind: input, shape index: {}]   ;;  %s308_s1 = inlined_call_operand.vmem [shape: bf16[128,128], index: 1, kind: input, shape index: {}]   ;;  %s309_s2 = inlined_call_operand.vmem [shape: f32[1,128], index: 2, kind: input, shape index: {}]   ;;  %s310_s3 = inlined_call_operand.hbm [shape: f32[32,128], index: 3, kind: output, shape index: {}]  }
   0x1   :  { %v216_v0 = vld [vmem:[%s308_s1 + $0x38] sm:$0xff]   ;;  %v217_v1 = vld [vmem:[%s308_s1 + $0x30] sm:$0xff]   ;;  %v218_v2 = vld [vmem:[%s308_s1 + $0x28] sm:$0xff]  }
   0x2   :  { %193 = vmatprep.subr.bf16.mxu0 %v216_v0  ;;  %v219_v3 = vld [vmem:[%s308_s1 + $0x20] sm:$0xff]  }
   0x3   :  { %194 = vmatpush3.bf16.msra.mxu0 %v216_v0  ;;  %v224_v4 = vld [vmem:[%s307_s0] sm:$0xff]  }
   0x4   :  { %195 = vmatprep.subr.bf16.mxu0 %v217_v1  ;;  %209 = vmatprep.mubr.bf16.mxu0 %v224_v4 }
   0x7   :  { %196 = vmatpush3.bf16.msra.mxu0 %v217_v1 }
   0x8   :  { %197 = vmatprep.subr.bf16.mxu0 %v218_v2 }
   0x9   :  { %8 = vsyncpa [#allocation3], 0  ;;  %v220_v5 = vld [vmem:[%s308_s1 + $0x18] sm:$0xff]   ;;  %v221_v6 = vld [vmem:[%s308_s1 + $0x10] sm:$0xff]   ;;  %s248_s7 = smov [#allocation2]  }
   0xa   :  { %v222_v7 = vld [vmem:[%s308_s1 + $0x8] sm:$0xff]   ;;  %v223_v8 = vld [vmem:[%s308_s1] sm:$0xff]   ;;  %s161_s8 = sshll.u32 %s248_s7, 4  ;;  %s162_s8 = int_to_ptr.vmem [resolvable:$true] %s161_s8 }
   0xb   :  { %198 = vmatpush3.bf16.msra.mxu0 %v218_v2  ;;  %v225_v9 = vld [vmem:[%s307_s0 + $0x8] sm:$0xff]   ;;  %v172_v10 = vld [vmem:[%s309_s2] ss:$0 sm:$0xff]  ;;  %s226_s0 = scalar_lea.vmem %s162_s8, 512  ;;  %p231_p1 = scmp.lt.s32.totalorder %s162_s8, %s162_s8 }
   0xc   :  { %199 = vmatprep.subr.bf16.mxu0 %v219_v3  ;;  %p227_p0 = scmp.ne.s32.totalorder %s162_s8, %s226_s0  ;;  %p232_p2 = scmp.lt.s32.totalorder %s226_s0, %s226_s0 }
   0xe   :  { %p233_p3 = por %p232_p2, %p231_p1 }
   0xf   :  { %200 = vmatpush3.bf16.msra.mxu0 %v219_v3 }
  0x10   :  { %201 = vmatprep.subr.bf16.mxu0 %v220_v5  ;;  %p234_p4 = pnand %p233_p3, %p227_p0 }
  0x13   :  { %202 = vmatpush3.bf16.msra.mxu0 %v220_v5 }
  0x14   :  { %203 = vmatprep.subr.bf16.mxu0 %v221_v6 }
  0x17   :  { %204 = vmatpush3.bf16.msra.mxu0 %v221_v6 }
  0x18   :  { %205 = vmatprep.subr.bf16.mxu0 %v222_v7 }
  0x1b   :  { %206 = vmatpush3.bf16.msra.mxu0 %v222_v7 }
  0x1c   :  { %207 = vmatprep.subr.bf16.mxu0 %v223_v8 }
  0x1f   :  { %208 = vmatpush3.bf16.msra.mxu0 %v223_v8 }
  0x22   :  { %210 = vmatmul.mubr.bf16.vlgmr.msra.gmra.mxu0 %v225_v9 }
  0xe2   :  { %v211_v11 = vpop.f32.mrf.mxu0 }
  0xe3   :  { %v146_v12 = vadd.f32 %v211_v11, %v172_v10 }
  0xe4   :  { %v137_v13 = vpop.f32.mrf.mxu0 }
  0xe5   :  { %154 = vst [vmem:[#allocation2 + $0x10] sm:$0xff] %v146_v12  ;;  %v138_v14 = vadd.f32 %v172_v10, %v137_v13 }
  0xe6   :  { %v212_v15 = vpop.f32.mrf.mxu0 }
  0xe7   :  { %152 = vst [vmem:[#allocation2] sm:$0xff] %v138_v14  ;;  %v149_v16 = vadd.f32 %v212_v15, %v172_v10 }
  0xe8   :  { %v140_v17 = vpop.f32.mrf.mxu0 }
  0xe9   :  { %155 = vst [vmem:[#allocation2 + $0x18] sm:$0xff] %v149_v16  ;;  %v141_v18 = vadd.f32 %v172_v10, %v140_v17 }
  0xeb   :  { %153 = vst [vmem:[#allocation2 + $0x8] sm:$0xff] %v141_v18 }
  0xec   :  { %237 = shalt.err (!%p234_p4)
}
  0xed   :  { %s249_s1 = smov 128   ;;  %s250_s2 = smov 8  }
  0xee   :  { %167 = dma.vmem_to_hbm [thread:$0]  %s162_s8, 512, %s310_s3, [#allocation3], %s249_s1, %s249_s1, %s250_s2  }
  0xef   :  { %246 = dma.done.wait [#allocation3], 512  }
  0xf0   :  { %247 = vsyncadd [#allocation3], 4294966784 }
  0xf1   :  { %171 = vsyncpa [#allocation3], 1 }

</bundles_post_ra>
